<compile_context>
chip_gen: v6e
topology: v6e:2x2x1
jax: 0.10.0
libtpu: 0.0.40
codegen_flags: <defaults>
</compile_context>

<pallas_src>
import math

import jax
import jax.numpy as jnp
from jax.experimental import pallas as pl
from jax.experimental.pallas import tpu as pltpu


def _patch_merging_kernel(x_ref, w_even_ref, w_odd_ref, ep_ref, o_ref):
    """One tile of PatchMerging.

    x_ref:      (tq, 2, Wh, 2C) raw input block; axis 1 is the image-row
                parity (dh), the last axis is [dw=0 channels | dw=1 channels].
    w_even_ref: (2C, Cout) gamma-folded weight rows for channels [x0 | x2].
    w_odd_ref:  (2C, Cout) gamma-folded weight rows for channels [x1 | x3].
    ep_ref:     (2, Cout) f32 epilogue constants:
                  row 0: colsum = ones(4C) @ (gamma[:,None] * W)
                  row 1: bias   = beta @ W
    o_ref:      (tq*Wh, Cout) merged-row outputs for this tile.
    """
    tq, _, wh, c2 = x_ref.shape
    rows = tq * wh
    f32 = jnp.float32

    # Even / odd image rows of each 2x2 window.  The (tq, Wh) -> rows collapse
    # is a free relabel whenever Wh is a multiple of the sublane count (8 for
    # f32 I/O, 16 for bf16); at deep Swin stages (Wh = 14 / 7) it costs one
    # relayout copy per step, where the tensors are tiny anyway.
    xe = x_ref[:, 0].reshape(rows, c2)          # channels [x0 | x2]
    xo = x_ref[:, 1].reshape(rows, c2)          # channels [x1 | x3]

    # LayerNorm statistics over the full merged 4C row, in f32, from the RAW
    # rows: the mean subtraction is folded into the epilogue, and
    # var = E[x^2] - mean^2 (validated against the two-pass reference below).
    xe32 = xe.astype(f32)
    xo32 = xo.astype(f32)
    inv_n = 1.0 / (2.0 * c2)                    # 1 / (4*dim)
    s1 = (jnp.sum(xe32, axis=-1, keepdims=True)
          + jnp.sum(xo32, axis=-1, keepdims=True))
    s2 = (jnp.sum(xe32 * xe32, axis=-1, keepdims=True)
          + jnp.sum(xo32 * xo32, axis=-1, keepdims=True))
    mean = s1 * inv_n
    var = jnp.maximum(s2 * inv_n - mean * mean, 0.0)
    inv_std = jax.lax.rsqrt(var + 1e-5)

    # Projection of the raw rows on the MXU, f32 accumulation.  Keeping two
    # accumulated dots (instead of concatenating operands) maps onto the v7x
    # MRB in-place accumulate and avoids a VMEM concat copy.
    acc = jnp.dot(xe, w_even_ref[...], preferred_element_type=f32)
    acc = acc + jnp.dot(xo, w_odd_ref[...], preferred_element_type=f32)

    colsum = ep_ref[0:1, :]                     # (1, Cout)
    bias = ep_ref[1:2, :]                       # (1, Cout)
    out = (acc - mean * colsum) * inv_std + bias
    o_ref[...] = out.astype(o_ref.dtype)


def patch_merging(x, input_resolution, gamma, beta, weight, *,
                  row_block=1024, min_grid_steps=8):
    """Equivalent of PatchMerging.forward.

    x:      (B, L, C) with L = H * W (row-major H, W)
    gamma:  (4C,) LayerNorm weight
    beta:   (4C,) LayerNorm bias
    weight: (4C, 2C) reduction matrix applied as x_normed @ weight (torch W.T)
    returns (B, ceil(H/2)*ceil(W/2), 2C) in x.dtype

    The MXU dots run in x.dtype (pass bf16 activations for the fast path);
    LayerNorm statistics and the accumulation are always f32.
    """
    H, W = input_resolution
    B, L, C = x.shape
    assert L == H * W, "sequence length must equal H*W"
    assert weight.shape[0] == 4 * C
    Cout = weight.shape[1]

    xv = x.reshape(B, H, W, C)
    if H % 2 == 1 or W % 2 == 1:
        # Rare path: pad to even spatial dims (this one does materialize).
        xv = jnp.pad(xv, ((0, 0), (0, H % 2), (0, W % 2), (0, 0)))
        H, W = xv.shape[1], xv.shape[2]
    Hh, Wh = H // 2, W // 2

    # Free contiguous view: (B*Hh, 2[dh], Wh, 2C); last axis = [dw=0 | dw=1].
    xr = xv.reshape(B * Hh, 2, Wh, 2 * C)

    # Fold LayerNorm affine AND the mean subtraction into the projection:
    #   out = (x_merged @ Wg - mean * (1 @ Wg)) * inv_std + beta @ W
    # where Wg = gamma[:,None] * W.
    f32 = jnp.float32
    w32 = weight.astype(f32)
    wg = gamma.astype(f32)[:, None] * w32                       # (4C, Cout)
    mxu_dtype = x.dtype
    # Merged channel order is [x0, x1, x2, x3]; even image rows carry [x0|x2],
    # odd image rows carry [x1|x3] — permute the weight rows to match.
    w_even = jnp.concatenate([wg[0:C], wg[2 * C:3 * C]], axis=0).astype(mxu_dtype)
    w_odd = jnp.concatenate([wg[C:2 * C], wg[3 * C:4 * C]], axis=0).astype(mxu_dtype)
    colsum = jnp.sum(wg, axis=0, keepdims=True)                 # (1, Cout) f32
    bias = (beta.astype(f32) @ w32).reshape(1, Cout)            # (1, Cout) f32
    epilogue = jnp.concatenate([colsum, bias], axis=0)          # (2, Cout) f32

    BHh = B * Hh
    M = BHh * Wh

    in_item = jnp.dtype(x.dtype).itemsize
    out_item = in_item
    w_item = jnp.dtype(mxu_dtype).itemsize

    # ---- generation-aware VMEM limit (~75% of physical) -------------------
    try:
        vmem_cap = int(pltpu.get_tpu_info().vmem_capacity_bytes)
    except Exception:
        vmem_cap = 64 * 1024 * 1024            # conservative (v7x-sized) fallback
    vmem_limit = min(int(vmem_cap * 0.75), 100 * 1024 * 1024)
    vmem_budget = int(vmem_limit * 0.7)        # headroom for compiler scratch

    # ---- choose tq = image-row-pairs per grid step (tq*Wh merged rows) -----
    sub = 8 * max(1, 4 // in_item)             # sublane packing of the i/o dtype
    step = sub // math.gcd(Wh, sub)            # tq % step == 0 => tq*Wh % sub == 0

    def _vmem_est(t):
        rows = t * Wh
        in_b = t * 2 * Wh * 2 * C * in_item                # input block
        out_b = rows * Cout * out_item                     # output block
        w_b = 2 * (2 * C) * Cout * w_item                  # both weight halves
        # honest f32 temporaries: stat upcasts/squares + acc + epilogue result
        tmp = 2 * rows * 2 * C * 4 + 2 * rows * Cout * 4
        return 2 * (in_b + out_b) + 2 * w_b + tmp + 2 * Cout * 4

    # Target ~row_block merged rows per step, but keep >= min_grid_steps grid
    # steps when possible so v7x can shard the parallel axis across its two
    # TensorCores and each core still double-buffers.
    tq = min(max(1, row_block // Wh), max(1, BHh // min_grid_steps))
    tq = max(step, (tq // step) * step)
    tq = min(tq, BHh)
    while tq > step and _vmem_est(tq) > vmem_budget:
        tq -= step
    if tq < BHh:
        # Rebalance so the ragged last block isn't tiny (core load balance).
        nsteps = pl.cdiv(BHh, tq)
        tq = min(tq, pl.cdiv(pl.cdiv(BHh, nsteps), step) * step)
    grid = (pl.cdiv(BHh, tq),)

    cost = pl.CostEstimate(
        flops=2 * M * (4 * C) * Cout,
        transcendentals=M,
        bytes_accessed=(M * 4 * C * in_item + M * Cout * out_item
                        + 2 * (2 * C) * Cout * w_item + 2 * Cout * 4),
    )

    out = pl.pallas_call(
        _patch_merging_kernel,
        out_shape=jax.ShapeDtypeStruct((M, Cout), x.dtype),
        grid=grid,
        in_specs=[
            pl.BlockSpec((tq, 2, Wh, 2 * C), lambda i: (i, 0, 0, 0)),
            pl.BlockSpec((2 * C, Cout), lambda i: (0, 0)),
            pl.BlockSpec((2 * C, Cout), lambda i: (0, 0)),
            pl.BlockSpec((2, Cout), lambda i: (0, 0)),
        ],
        out_specs=pl.BlockSpec((tq * Wh, Cout), lambda i: (i, 0)),
        compiler_params=pltpu.CompilerParams(
            dimension_semantics=("parallel",),
            vmem_limit_bytes=vmem_limit,
        ),
        cost_estimate=cost,
    )(xr, w_even, w_odd, epilogue)

    return out.reshape(B, Hh * Wh, Cout)


def _reference(x, input_resolution, gamma, beta, weight):
    """Pure-JAX f32 reference mirroring the PyTorch module."""
    H, W = input_resolution
    B, L, C = x.shape
    xv = x.astype(jnp.float32).reshape(B, H, W, C)
    if H % 2 == 1 or W % 2 == 1:
        xv = jnp.pad(xv, ((0, 0), (0, H % 2), (0, W % 2), (0, 0)))
        H, W = xv.shape[1], xv.shape[2]
    x0 = xv[:, 0::2, 0::2, :]
    x1 = xv[:, 1::2, 0::2, :]
    x2 = xv[:, 0::2, 1::2, :]
    x3 = xv[:, 1::2, 1::2, :]
    xm = jnp.concatenate([x0, x1, x2, x3], axis=-1).reshape(B, -1, 4 * C)
    mean = jnp.mean(xm, axis=-1, keepdims=True)
    var = jnp.mean(jnp.square(xm - mean), axis=-1, keepdims=True)
    xn = (xm - mean) * jax.lax.rsqrt(var + 1e-5) * gamma + beta
    return xn @ weight.astype(jnp.float32)


if __name__ == "__main__":
    # Small deterministic example with lane-dense output (2C = 128):
    # B=2, H=W=16, dim=C=64 -> L=256, 4C=256, 2C=128.
    B, H, W, C = 2, 16, 16, 64
    key = jax.random.PRNGKey(0)
    kx, kw, kg, kb = jax.random.split(key, 4)

    x = jax.random.normal(kx, (B, H * W, C), dtype=jnp.float32)

    # Non-trivial LayerNorm affine so the gamma/beta/mean folding is exercised.
    gamma = 1.0 + 0.1 * jax.random.normal(kg, (4 * C,), dtype=jnp.float32)
    beta = 0.05 * jax.random.normal(kb, (4 * C,), dtype=jnp.float32)

    # nn.Linear(4C, 2C, bias=False): stored here as (4C, 2C) = torch W.T.
    bound = 1.0 / math.sqrt(4.0 * C)
    weight = jax.random.uniform(
        kw, (4 * C, 2 * C), jnp.float32, minval=-bound, maxval=bound)

    ref = _reference(x, (H, W), gamma, beta, weight)

    # Case 1: default tiling (even grid division).
    out = patch_merging(x, (H, W), gamma, beta, weight)
    out = jax.block_until_ready(out)
    assert out.shape == (B, (H // 2) * (W // 2), 2 * C)
    assert jnp.allclose(out, ref, atol=3e-2, rtol=3e-2), float(
        jnp.max(jnp.abs(out - ref)))

    # Case 2: force a ragged last grid block (BHh % tq != 0) to exercise the
    # masked-writeback edge path flagged in the review.
    out_ragged = patch_merging(x, (H, W), gamma, beta, weight,
                               row_block=24, min_grid_steps=4)
    out_ragged = jax.block_until_ready(out_ragged)
    assert jnp.allclose(out_ragged, ref, atol=3e-2, rtol=3e-2), float(
        jnp.max(jnp.abs(out_ragged - ref)))

    print("KERNEL_OK")
</pallas_src>

<mosaic_0001>
module attributes {stable_mosaic.version = 11 : i64} {
  func.func @_patch_merging_kernel(%arg0: i32, %arg1: memref<2x2x8x128xf32, #tpu.memory_space<vmem>>, %arg2: memref<128x128xf32, #tpu.memory_space<vmem>>, %arg3: memref<128x128xf32, #tpu.memory_space<vmem>>, %arg4: memref<2x128xf32, #tpu.memory_space<vmem>>, %arg5: memref<16x128xf32, #tpu.memory_space<vmem>>) attributes {dimension_semantics = [#tpu.dimension_semantics<parallel>], iteration_bounds = array<i64: 8>, scalar_prefetch = 0 : i64, scratch_operands = 0 : i64, tpu.core_type = #tpu.core_type<tc>, window_params = [{transform_indices = @transform_0, window_bounds = array<i64: 2, 2, 8, 128>}, {pipeline_mode = #tpu.pipeline_mode<synchronous>, transform_indices = @transform_1, window_bounds = array<i64: 128, 128>}, {pipeline_mode = #tpu.pipeline_mode<synchronous>, transform_indices = @transform_2, window_bounds = array<i64: 128, 128>}, {pipeline_mode = #tpu.pipeline_mode<synchronous>, transform_indices = @transform_3, window_bounds = array<i64: 2, 128>}, {transform_indices = @transform_4, window_bounds = array<i64: 16, 128>}]} {
    %c0 = arith.constant 0 : index
    %c0_0 = arith.constant 0 : index
    %c0_1 = arith.constant 0 : index
    %c0_2 = arith.constant 0 : index
    %0 = vector.load %arg1[%c0, %c0_0, %c0_1, %c0_2] : memref<2x2x8x128xf32, #tpu.memory_space<vmem>>, vector<2x1x8x128xf32>
    %1 = vector.shape_cast %0 : vector<2x1x8x128xf32> to vector<2x8x128xf32>
    %2 = vector.shape_cast %1 : vector<2x8x128xf32> to vector<16x128xf32>
    %c0_3 = arith.constant 0 : index
    %c1 = arith.constant 1 : index
    %c0_4 = arith.constant 0 : index
    %c0_5 = arith.constant 0 : index
    %3 = vector.load %arg1[%c0_3, %c1, %c0_4, %c0_5] : memref<2x2x8x128xf32, #tpu.memory_space<vmem>>, vector<2x1x8x128xf32>
    %4 = vector.shape_cast %3 : vector<2x1x8x128xf32> to vector<2x8x128xf32>
    %5 = vector.shape_cast %4 : vector<2x8x128xf32> to vector<16x128xf32>
    %cst = arith.constant dense<0.000000e+00> : vector<16xf32>
    %6 = vector.multi_reduction <add>, %2, %cst [1] : vector<16x128xf32> to vector<16xf32>
    %7 = vector.shape_cast %6 : vector<16xf32> to vector<16x1xf32>
    %cst_6 = arith.constant dense<0.000000e+00> : vector<16xf32>
    %8 = vector.multi_reduction <add>, %5, %cst_6 [1] : vector<16x128xf32> to vector<16xf32>
    %9 = vector.shape_cast %8 : vector<16xf32> to vector<16x1xf32>
    %10 = arith.addf %7, %9 : vector<16x1xf32>
    %11 = arith.mulf %2, %2 : vector<16x128xf32>
    %cst_7 = arith.constant dense<0.000000e+00> : vector<16xf32>
    %12 = vector.multi_reduction <add>, %11, %cst_7 [1] : vector<16x128xf32> to vector<16xf32>
    %13 = vector.shape_cast %12 : vector<16xf32> to vector<16x1xf32>
    %14 = arith.mulf %5, %5 : vector<16x128xf32>
    %cst_8 = arith.constant dense<0.000000e+00> : vector<16xf32>
    %15 = vector.multi_reduction <add>, %14, %cst_8 [1] : vector<16x128xf32> to vector<16xf32>
    %16 = vector.shape_cast %15 : vector<16xf32> to vector<16x1xf32>
    %17 = arith.addf %13, %16 : vector<16x1xf32>
    %cst_9 = arith.constant 3.906250e-03 : f32
    %18 = vector.broadcast %cst_9 : f32 to vector<16x1xf32>
    %19 = arith.mulf %10, %18 : vector<16x1xf32>
    %cst_10 = arith.constant 3.906250e-03 : f32
    %20 = vector.broadcast %cst_10 : f32 to vector<16x1xf32>
    %21 = arith.mulf %17, %20 : vector<16x1xf32>
    %22 = arith.mulf %19, %19 : vector<16x1xf32>
    %23 = arith.subf %21, %22 : vector<16x1xf32>
    %cst_11 = arith.constant 0.000000e+00 : f32
    %24 = vector.broadcast %cst_11 : f32 to vector<16x1xf32>
    %25 = arith.maximumf %23, %24 : vector<16x1xf32>
    %cst_12 = arith.constant 9.99999974E-6 : f32
    %26 = vector.broadcast %cst_12 : f32 to vector<16x1xf32>
    %27 = arith.addf %25, %26 : vector<16x1xf32>
    %28 = math.rsqrt %27 : vector<16x1xf32>
    %c0_13 = arith.constant 0 : index
    %c0_14 = arith.constant 0 : index
    %29 = vector.load %arg2[%c0_13, %c0_14] : memref<128x128xf32, #tpu.memory_space<vmem>>, vector<128x128xf32>
    %cst_15 = arith.constant dense<0.000000e+00> : vector<16x128xf32>
    %30 = tpu.matmul %2, %29, %cst_15 {dimension_numbers = #tpu.dot_dimension_numbers<[1], [0], [0], [1], [0, 0, 1, 1], [], []>} : vector<16x128xf32>, vector<128x128xf32>, vector<16x128xf32> -> vector<16x128xf32>
    %c0_16 = arith.constant 0 : index
    %c0_17 = arith.constant 0 : index
    %31 = vector.load %arg3[%c0_16, %c0_17] : memref<128x128xf32, #tpu.memory_space<vmem>>, vector<128x128xf32>
    %cst_18 = arith.constant dense<0.000000e+00> : vector<16x128xf32>
    %32 = tpu.matmul %5, %31, %cst_18 {dimension_numbers = #tpu.dot_dimension_numbers<[1], [0], [0], [1], [0, 0, 1, 1], [], []>} : vector<16x128xf32>, vector<128x128xf32>, vector<16x128xf32> -> vector<16x128xf32>
    %33 = arith.addf %30, %32 : vector<16x128xf32>
    %c0_19 = arith.constant 0 : index
    %c0_20 = arith.constant 0 : index
    %34 = vector.load %arg4[%c0_19, %c0_20] : memref<2x128xf32, #tpu.memory_space<vmem>>, vector<1x128xf32>
    %c1_21 = arith.constant 1 : index
    %c0_22 = arith.constant 0 : index
    %35 = vector.load %arg4[%c1_21, %c0_22] : memref<2x128xf32, #tpu.memory_space<vmem>>, vector<1x128xf32>
    %36 = vector.broadcast %19 : vector<16x1xf32> to vector<16x128xf32>
    %37 = vector.broadcast %34 : vector<1x128xf32> to vector<16x128xf32>
    %38 = arith.mulf %36, %37 : vector<16x128xf32>
    %39 = arith.subf %33, %38 : vector<16x128xf32>
    %40 = vector.broadcast %28 : vector<16x1xf32> to vector<16x128xf32>
    %41 = arith.mulf %39, %40 : vector<16x128xf32>
    %42 = vector.broadcast %35 : vector<1x128xf32> to vector<16x128xf32>
    %43 = arith.addf %41, %42 : vector<16x128xf32>
    %c0_23 = arith.constant 0 : index
    %c0_24 = arith.constant 0 : index
    %44 = vector.load %arg5[%c0_23, %c0_24] : memref<16x128xf32, #tpu.memory_space<vmem>>, vector<16x128xf32>
    tpu.vector_store %arg5[%c0_23, %c0_24], %43 {strides = array<i32>} : memref<16x128xf32, #tpu.memory_space<vmem>>, vector<16x128xf32>,
    return
  }
  func.func @transform_0(%arg0: i32) -> (i32, i32, i32, i32) {
    %c0_i32 = arith.constant 0 : i32
    %c0_i32_0 = arith.constant 0 : i32
    %c0_i32_1 = arith.constant 0 : i32
    %c0_i32_2 = arith.constant 0 : i32
    return %arg0, %c0_i32, %c0_i32_0, %c0_i32_1 : i32, i32, i32, i32
  }
  func.func @transform_1(%arg0: i32) -> (i32, i32) {
    %c0_i32 = arith.constant 0 : i32
    %c0_i32_0 = arith.constant 0 : i32
    %c0_i32_1 = arith.constant 0 : i32
    return %c0_i32, %c0_i32_0 : i32, i32
  }
  func.func @transform_2(%arg0: i32) -> (i32, i32) {
    %c0_i32 = arith.constant 0 : i32
    %c0_i32_0 = arith.constant 0 : i32
    %c0_i32_1 = arith.constant 0 : i32
    return %c0_i32, %c0_i32_0 : i32, i32
  }
  func.func @transform_3(%arg0: i32) -> (i32, i32) {
    %c0_i32 = arith.constant 0 : i32
    %c0_i32_0 = arith.constant 0 : i32
    %c0_i32_1 = arith.constant 0 : i32
    return %c0_i32, %c0_i32_0 : i32, i32
  }
  func.func @transform_4(%arg0: i32) -> (i32, i32) {
    %c0_i32 = arith.constant 0 : i32
    %c0_i32_0 = arith.constant 0 : i32
    return %arg0, %c0_i32 : i32, i32
  }
}

</mosaic_0001>

<bundles_post_ra>
// kernel: tpu_custom_call.1
= control target key start
LH: loop header
LB: loop body
LE: loop exit
PB: predicated region body
PF: predicated region fallthrough
CT: control target
= control target key end

     0   :  { %9 = vsyncpa [#allocation3], 0  ;;  %s1197_s0 = inlined_call_operand.hbm [shape: f32[16,2,8,128], index: 0, kind: input, shape index: {}]   ;;  %s1198_s1 = inlined_call_operand.hbm [shape: f32[128,128], index: 1, kind: input, shape index: {}]   ;;  %s1199_s2 = inlined_call_operand.hbm [shape: f32[128,128], index: 2, kind: input, shape index: {}]   ;;  %s1200_s3 = inlined_call_operand.vmem [shape: f32[2,128], index: 3, kind: input, shape index: {}]   ;;  %s1201_s4 = inlined_call_operand.hbm [shape: f32[128,128], index: 4, kind: output, shape index: {}]  }
   0x1   :  { %11 = vsyncpa [#allocation3 + $0x1], 0 }
   0x2   :  { %12 = vsyncpa [#allocation6], 0 }
   0x3   :  { %13 = vsyncpa [#allocation4], 0 }
   0x4   :  { %15 = vsyncpa [#allocation4 + $0x1], 0  ;;  %s989_s15 = smov 0   ;;  %s991_s16 = smov 0  }
   0x5   :  { %s993_s17 = smov 0   ;;  %s995_s18 = smov 0  }
   0x6 LB: > { %s1010_s19 = sadd.s32 4294967295, %s954_s18   ;;  %s599_s20 = sadd.s32 4294967294, %s954_s18   ;;  %s954_s18 = sphi %s995_s18, %s1221_s18   ;;  %s950_s17 = sphi %s993_s17, %s1220_s17   ;;  %s946_s16 = sphi %s991_s16, %s1219_s16   ;;  %s942_s15 = sphi %s989_s15, %s1218_s15  }
   0x7   : > { %p41_p0 = scmp.ne.s32.totalorder %s946_s16, %s942_s15  ;;  %p1202_p1 = scmp.eq.s32.totalorder %s1010_s19, 0 }
   0x8   : > { %p128_p2 = scmp.eq.s32.totalorder %s1010_s19, 7  ;;  %p134_p3 = scmp.eq.s32.totalorder %s599_s20, 7 }
   0x9   : > { %p1019_p4 = por %p1202_p1, %p41_p0  ;;  %p600_p5 = scmp.ge.s32.totalorder %s954_s18, 1 }
   0xa   : > { %p1024_p6 = por %p134_p3, %p41_p0  ;;  %p141_p7 = scmp.lt.s32.totalorder %s954_s18, 9 }
   0xb   : > { %s1206_s21 = scalar_select %p1019_p4, 1, 0 }
   0xc   : > { %s1207_s22 = scalar_select %p1024_p6, 1, 0 }
   0xd   : > { %p1029_p8 = pnand %p600_p5, %p141_p7  ;;  %s956_s24 = smov [#allocation5]  }
   0xe   : > { %s153_s25 = sshll.u32 %s956_s24, 4  ;;  %s957_s27 = smov [#allocation7]   ;;  %s154_s25 = int_to_ptr.vmem [resolvable:$true] %s153_s25 }
   0xf   : > { %s1208_s23 = scalar_select %p1029_p8, 1, 0 }
  0x10   : > { %p743_p9 = pneg %p1029_p8  ;;  %s166_s28 = sshll.u32 %s957_s27, 4  ;;  %s167_s28 = int_to_ptr.vmem [resolvable:$true] %s166_s28 }
  0x11   : > { %s817_s29 = scalar_lea.vmem %s154_s25, 2048  ;;  %p825_p3 = scmp.lt.s32.totalorder %s154_s25, %s154_s25 }
  0x12   : > { %p1037_p10 = pnand %p743_p9, %p1202_p1  ;;  %p818_p12 = scmp.ne.s32.totalorder %s154_s25, %s817_s29 }
  0x13   : > { %p826_p5 = scmp.lt.s32.totalorder %s817_s29, %s817_s29 }
  0x14   : > { %p808_p11 = pneg %p1037_p10 }
  0x15   : > { %p827_p7 = por %p826_p5, %p825_p3 }
  0x16   : > { %p820_p13 = pnand %p818_p12, %p808_p11 }
  0x18   : > { %p821_p0 = pneg %p820_p13 }
  0x1a   : > { %p828_p9 = pnand %p827_p7, %p821_p0 }
  0x1c   : > { %831 = shalt.err (!%p828_p9)
}
  0x1d   : > { %s958_s30 = smov 128   ;;  %s959_s5 = smov 8  }
  0x1e   : > { %746 = dma.hbm_to_vmem [thread:$0]  (!%p1037_p10), %s1198_s1, 2048, %s154_s25, [#allocation6], %s958_s30, %s958_s30, %s959_s5  }
  0x1f   : > { %s843_s8 = scalar_lea.vmem %s167_s28, 2048  ;;  %p851_p0 = scmp.lt.s32.totalorder %s167_s28, %s167_s28 }
  0x20   : > { %p844_p12 = scmp.ne.s32.totalorder %s167_s28, %s843_s8  ;;  %p852_p5 = scmp.lt.s32.totalorder %s843_s8, %s843_s8 }
  0x22   : > { %p846_p13 = pnand %p844_p12, %p808_p11  ;;  %p853_p7 = por %p852_p5, %p851_p0 }
  0x24   : > { %p847_p3 = pneg %p846_p13 }
  0x26   : > { %p854_p9 = pnand %p853_p7, %p847_p3 }
  0x28   : > { %857 = shalt.err (!%p854_p9)
}
  0x29   : > { %749 = dma.hbm_to_vmem [thread:$0]  (!%p1037_p10), %s1199_s2, 2048, %s167_s28, [#allocation6], %s958_s30, %s958_s30, %s959_s5  }
  0x2a   : > { %s1066_s11 = sadd.s32 1, %s954_s18   ;;  %s28_s12 = sadd.s32 1, %s950_s17 }
  0x2b   : > { %s25_s13 = ssub.s32 %s954_s18, %s1066_s11  ;;  %p35_p11 = scmp.ne.s32.totalorder %s950_s17, %s946_s16 }
  0x2c   : > { %p26_p12 = scmp.eq.s32.totalorder %s25_s13, 0  ;;  %p36_p13 = scmp.eq.s32.totalorder %s954_s18, 0 }
  0x2d   : > { %p1076_p3 = por %p128_p2, %p35_p11  ;;  %p760_p0 = scmp.lt.s32.totalorder %s954_s18, 8 }
  0x2e   : > { %s1082_s20 = scalar_select %p26_p12, %s950_s17, %s28_s12  }
  0x2f   : > { %s1210_s14 = scalar_select %p1076_p3, 1, 0 }
  0x30   : > { %p37_p5 = por %p36_p13, %p35_p11  ;;  %s183_s24 = sand.u32 1, %s950_s17  }
  0x31   : > { %s604_s25 = sshll.u32 %s183_s24, 5  ;;  %s623_s26 = sshll.u32 %s954_s18, 9 }
  0x32   : > { %s1089_s29 = scalar_lea.hbm %s1197_s0, %s623_s26  ;;  %s187_s6 = scalar_lea.vmem [#allocation2], %s604_s25 }
  0x33   : > { %s195_s7 = sshll.u32 %s187_s6, 4  ;;  %p1093_p2 = pnand %p760_p0, %p37_p5  ;;  %s1091_s7 = int_to_ptr.vmem [resolvable:$true] %s195_s7 }
  0x34   : > { %s1097_s9 = scalar_lea.sflag [#allocation3], %s183_s24  ;;  %s858_s10 = scalar_lea.hbm %s1089_s29, 512 }
  0x35   : > { %p859_p10 = scmp.ne.s32.totalorder %s1089_s29, %s858_s10  ;;  %p860_p7 = pneg %p1093_p2 }
  0x36   : > { %s863_s25 = scalar_lea.hbm %s1197_s0, 4096  ;;  %p864_p12 = scmp.lt.s32.totalorder %s1089_s29, %s1197_s0 }
  0x37   : > { %p861_p9 = pnand %p860_p7, %p859_p10  ;;  %p865_p13 = scmp.lt.s32.totalorder %s863_s25, %s858_s10 }
  0x39   : > { %p862_p11 = pneg %p861_p9  ;;  %p866_p0 = por %p865_p13, %p864_p12 }
  0x3b   : > { %p867_p5 = pnand %p866_p0, %p862_p11 }
  0x3d   : > { %870 = shalt.err (!%p867_p5)
}
  0x3e   : > { %s871_s24 = scalar_lea.vmem %s1091_s7, 512  ;;  %s960_s28 = smov [#allocation2]  }
  0x3f   : > { %p872_p1 = scmp.ne.s32.totalorder %s1091_s7, %s871_s24  ;;  %s876_s6 = sshll.u32 %s960_s28, 4  ;;  %s877_s6 = int_to_ptr.vmem [resolvable:$false] %s876_s6 }
  0x40   : > { %s878_s12 = scalar_lea.vmem %s877_s6, 1024  ;;  %p879_p9 = scmp.lt.s32.totalorder %s1091_s7, %s877_s6 }
  0x41   : > { %p874_p6 = pnand %p872_p1, %p860_p7  ;;  %p880_p3 = scmp.lt.s32.totalorder %s878_s12, %s871_s24 }
  0x43   : > { %p875_p10 = pneg %p874_p6  ;;  %p881_p4 = por %p880_p3, %p879_p9 }
  0x45   : > { %p882_p8 = pnand %p881_p4, %p875_p10 }
  0x47   : > { %885 = shalt.err (!%p882_p8)
}
  0x48   : > { %753 = dma.hbm_to_vmem [thread:$0]  (!%p1093_p2), %s1089_s29, 512, %s1091_s7, %s1097_s9, %s958_s30, %s958_s30, %s959_s5  }
  0x49   : > { %p1212_p1 = scmp.ne.s32.totalorder %s1208_s23, 0 }
  0x4a   : > { %s1124_s10 = sand.u32 (!%p1212_p1), 1, %s946_s16   ;;  %p1213_p4 = scmp.ne.s32.totalorder (!%p1212_p1), %s1206_s21, 0 }
  0x4b   : > { %207 = sbr.rel (%p1212_p1) target bundleno = 336 (0x150), region = 36  ;;  %s609_s13 = sshll.u32 (!%p1212_p1), %s1124_s10, 5 }
  0x4c   : > { %s210_s25 = scalar_lea.sflag (!%p1212_p1), [#allocation3], %s1124_s10  ;;  %s1128_s26 = scalar_lea.vmem (!%p1212_p1), [#allocation2], %s609_s13 }
  0x50   : > { %929 = dma.done.wait (%p1213_p4), %s210_s25, 512  }
  0x51   : > { %931 = vsyncadd (%p1213_p4), %s210_s25, 4294966784  ;;  %p1214_p6 = scmp.eq.s32.totalorder %s1010_s19, 0 }
  0x53   : > { %933 = dma.done.wait (%p1214_p6), [#allocation6], 4096   ;;  %p1215_p8 = pmov %p1214_p6 }
  0x54   : > { %v322_v0 = vld [vmem:[#allocation7 + $0x78] sm:$0xff]  ;;  %v321_v2 = vld [vmem:[#allocation7 + $0x70] sm:$0xff]  ;;  %v320_v4 = vld [vmem:[#allocation7 + $0x68] sm:$0xff]  ;;  %s612_s21 = sshll.u32 %s1124_s10, 4  ;;  %s624_s9 = sshll.u32 %s1010_s19, 8 }
  0x55   : > { %935 = vsyncadd (%p1215_p8), [#allocation6], 4294963200  ;;  %v306_v1 = vld [vmem:[#allocation5 + $0x78] sm:$0xff]  ;;  %661 = vmatprep.subr.mxu0 %v322_v0  ;;  %v305_v3 = vld [vmem:[#allocation5 + $0x70] sm:$0xff]  ;;  %s245_s7 = scalar_lea.vmem [#allocation8], %s612_s21  ;;  %s1153_s28 = scalar_lea.hbm %s1201_s4, %s624_s9 }
  0x56   : > { %696 = vmatprep.subr.mxu1 %v306_v1  ;;  %662 = vmatpush3.msra.mxu0 %v322_v0  ;;  %v304_v5 = vld [vmem:[#allocation5 + $0x68] sm:$0xff]  ;;  %v319_v6 = vld [vmem:[#allocation7 + $0x60] sm:$0xff]  ;;  %v318_v8 = vld [vmem:[#allocation7 + $0x58] sm:$0xff]  ;;  %s507_s8 = sshll.u32 %s245_s7, 4  ;;  %s494_s6 = scalar_lea.sflag [#allocation4], %s1124_s10  ;;  %s1155_s8 = int_to_ptr.vmem [resolvable:$true] %s507_s8 }
  0x57   : > { %697 = vmatpush3.msra.mxu1 %v306_v1  ;;  %663 = vmatprep.subr.mxu0 %v321_v2  ;;  %v303_v7 = vld [vmem:[#allocation5 + $0x60] sm:$0xff]  ;;  %v302_v9 = vld [vmem:[#allocation5 + $0x58] sm:$0xff]  ;;  %v317_v10 = vld [vmem:[#allocation7 + $0x50] sm:$0xff]  ;;  %s886_s12 = scalar_lea.vmem %s1155_s8, 256  ;;  %p1216_p2 = scmp.ne.s32.totalorder %s1210_s14, 0 }
  0x58   : > { %698 = vmatprep.subr.mxu1 %v305_v3  ;;  %664 = vmatpush3.msra.mxu0 %v321_v2  ;;  %v301_v11 = vld [vmem:[#allocation5 + $0x50] sm:$0xff]  ;;  %v316_v12 = vld [vmem:[#allocation7 + $0x48] sm:$0xff]  ;;  %v315_v14 = vld [vmem:[#allocation7 + $0x40] sm:$0xff]  ;;  %p887_p3 = scmp.ne.s32.totalorder %s1155_s8, %s886_s12  ;;  %s961_s19 = smov [#allocation8]  }
  0x59   : > { %699 = vmatpush3.msra.mxu1 %v305_v3  ;;  %665 = vmatprep.subr.mxu0 %v320_v4  ;;  %v300_v13 = vld [vmem:[#allocation5 + $0x48] sm:$0xff]  ;;  %v299_v15 = vld [vmem:[#allocation5 + $0x40] sm:$0xff]  ;;  %v314_v16 = vld [vmem:[#allocation7 + $0x38] sm:$0xff]  ;;  %s890_s13 = sshll.u32 %s961_s19, 4  ;;  %s891_s13 = int_to_ptr.vmem [resolvable:$false] %s890_s13 }
  0x5a   : > { %700 = vmatprep.subr.mxu1 %v304_v5  ;;  %666 = vmatpush3.msra.mxu0 %v320_v4  ;;  %v298_v17 = vld [vmem:[#allocation5 + $0x38] sm:$0xff]  ;;  %v313_v18 = vld [vmem:[#allocation7 + $0x30] sm:$0xff]  ;;  %v312_v20 = vld [vmem:[#allocation7 + $0x28] sm:$0xff]  ;;  %p888_p7 = pnand %p887_p3, %p1216_p2  ;;  %s892_s25 = scalar_lea.vmem %s891_s13, 512 }
  0x5b   : > { %701 = vmatpush3.msra.mxu1 %v304_v5  ;;  %667 = vmatprep.subr.mxu0 %v319_v6  ;;  %v297_v19 = vld [vmem:[#allocation5 + $0x30] sm:$0xff]  ;;  %v296_v21 = vld [vmem:[#allocation5 + $0x28] sm:$0xff]  ;;  %v311_v22 = vld [vmem:[#allocation7 + $0x20] sm:$0xff]  ;;  %p893_p12 = scmp.lt.s32.totalorder %s1155_s8, %s891_s13  ;;  %p894_p13 = scmp.lt.s32.totalorder %s892_s25, %s886_s12 }
  0x5c   : > { %702 = vmatprep.subr.mxu1 %v303_v7  ;;  %668 = vmatpush3.msra.mxu0 %v319_v6  ;;  %v295_v23 = vld [vmem:[#allocation5 + $0x20] sm:$0xff]  ;;  %v310_v24 = vld [vmem:[#allocation7 + $0x18] sm:$0xff]  ;;  %v309_v26 = vld [vmem:[#allocation7 + $0x10] sm:$0xff]  ;;  %p889_p11 = pneg %p888_p7 }
  0x5d   : > { %703 = vmatpush3.msra.mxu1 %v303_v7  ;;  %669 = vmatprep.subr.mxu0 %v318_v8  ;;  %v294_v25 = vld [vmem:[#allocation5 + $0x18] sm:$0xff]  ;;  %v293_v27 = vld [vmem:[#allocation5 + $0x10] sm:$0xff]  ;;  %v308_v28 = vld [vmem:[#allocation7 + $0x8] sm:$0xff]  ;;  %p895_p0 = por %p894_p13, %p893_p12 }
  0x5e   : > { %704 = vmatprep.subr.mxu1 %v302_v9  ;;  %670 = vmatpush3.msra.mxu0 %v318_v8  ;;  %v292_v29 = vld [vmem:[#allocation5 + $0x8] sm:$0xff]  ;;  %v307_v30 = vld [vmem:[#allocation7] sm:$0xff]  ;;  %v614_v34 = vld [vmem:[%s1128_s26 + $0x18] sm:$0xff] }
  0x5f   : > { %705 = vmatpush3.msra.mxu1 %v302_v9  ;;  %671 = vmatprep.subr.mxu0 %v317_v10  ;;  %v291_v31 = vld [vmem:[#allocation5] sm:$0xff]  ;;  %v613_v32 = vld [vmem:[%s1128_s26 + $0x8] sm:$0xff]  ;;  %v249_v35 = vld [vmem:[%s1128_s26 + $0x10] sm:$0xff]  ;;  %v270_v39 = vmul.f32 %v614_v34, %v614_v34  ;;  %p896_p5 = pnand %p895_p0, %p889_p11 }
  0x60   : > { %706 = vmatprep.subr.mxu1 %v301_v11  ;;  %672 = vmatpush3.msra.mxu0 %v317_v10  ;;  %v248_v33 = vld [vmem:[%s1128_s26] sm:$0xff]  ;;  %v264_v37 = vmul.f32 %v249_v35, %v249_v35  ;;  %v269_v38 = vmul.f32 %v613_v32, %v613_v32 }
  0x61   : > { %707 = vmatpush3.msra.mxu1 %v301_v11  ;;  %673 = vmatprep.subr.mxu0 %v316_v12  ;;  %v263_v36 = vmul.f32 %v248_v33, %v248_v33  ;;  %v615_v0 = vld [vmem:[%s1200_s3] ss:$0 sm:$0xff]  ;;  %v616_v11 = vld [vmem:[%s1200_s3 + $0x1] ss:$0 sm:$0xff] }
  0x62   : > { %708 = vmatprep.subr.mxu1 %v300_v13  ;;  %674 = vmatpush3.msra.mxu0 %v316_v12 }
  0x63   : > { %709 = vmatpush3.msra.mxu1 %v300_v13  ;;  %675 = vmatprep.subr.mxu0 %v315_v14 }
  0x64   : > { %710 = vmatprep.subr.mxu1 %v299_v15  ;;  %676 = vmatpush3.msra.mxu0 %v315_v14 }
  0x65   : > { %711 = vmatpush3.msra.mxu1 %v299_v15  ;;  %677 = vmatprep.subr.mxu0 %v314_v16 }
  0x66   : > { %712 = vmatprep.subr.mxu1 %v298_v17  ;;  %678 = vmatpush3.msra.mxu0 %v314_v16 }
  0x67   : > { %713 = vmatpush3.msra.mxu1 %v298_v17  ;;  %679 = vmatprep.subr.mxu0 %v313_v18 }
  0x68   : > { %714 = vmatprep.subr.mxu1 %v297_v19  ;;  %680 = vmatpush3.msra.mxu0 %v313_v18 }
  0x69   : > { %715 = vmatpush3.msra.mxu1 %v297_v19  ;;  %681 = vmatprep.subr.mxu0 %v312_v20 }
  0x6a   : > { %716 = vmatprep.subr.mxu1 %v296_v21  ;;  %682 = vmatpush3.msra.mxu0 %v312_v20 }
  0x6b   : > { %717 = vmatpush3.msra.mxu1 %v296_v21  ;;  %683 = vmatprep.subr.mxu0 %v311_v22 }
  0x6c   : > { %718 = vmatprep.subr.mxu1 %v295_v23  ;;  %684 = vmatpush3.msra.mxu0 %v311_v22 }
  0x6d   : > { %719 = vmatpush3.msra.mxu1 %v295_v23  ;;  %685 = vmatprep.subr.mxu0 %v310_v24 }
  0x6e   : > { %720 = vmatprep.subr.mxu1 %v294_v25  ;;  %686 = vmatpush3.msra.mxu0 %v310_v24 }
  0x6f   : > { %721 = vmatpush3.msra.mxu1 %v294_v25  ;;  %687 = vmatprep.subr.mxu0 %v309_v26 }
  0x70   : > { %722 = vmatprep.subr.mxu1 %v293_v27  ;;  %688 = vmatpush3.msra.mxu0 %v309_v26 }
  0x71   : > { %723 = vmatpush3.msra.mxu1 %v293_v27  ;;  %689 = vmatprep.subr.mxu0 %v308_v28 }
  0x72   : > { %724 = vmatprep.subr.mxu1 %v292_v29  ;;  %690 = vmatpush3.msra.mxu0 %v308_v28 }
  0x73   : > { %725 = vmatpush3.msra.mxu1 %v292_v29  ;;  %691 = vmatprep.subr.mxu0 %v307_v30 }
  0x74   : > { %726 = vmatprep.subr.mxu1 %v291_v31  ;;  %692 = vmatpush3.msra.mxu0 %v307_v30 }
  0x75   : > { %693 = vmatprep.mubr.f32.mxu0 %v613_v32  ;;  %727 = vmatpush3.msra.mxu1 %v291_v31 }
  0x76   : > { %728 = vmatprep.mubr.f32.mxu1 %v248_v33  ;;  %694 = vmatmul.mubr.f32.vlgmr.msra.gmra.mxu0 %v614_v34 }
  0x77   : > { %729 = vmatmul.mubr.f32.vlgmr.msra.gmra.mxu1 %v249_v35  ;;  %253 = vadd.xlane.f32.xlu0 %v248_v33 }
  0x78   : > { %257 = vadd.xlane.f32.xlu1 %v613_v32 }
  0x7b   : > { %255 = vadd.xlane.f32.xlu0 %v249_v35 }
  0x7c   : > { %259 = vadd.xlane.f32.xlu1 %v614_v34 }
  0x7f   : > { %265 = vadd.xlane.f32.xlu0 %v263_v36 }
  0x80   : > { %267 = vadd.xlane.f32.xlu1 %v264_v37 }
  0x83   : > { %271 = vadd.xlane.f32.xlu0 %v269_v38 }
  0x84   : > { %273 = vadd.xlane.f32.xlu1 %v270_v39 }
 0x100   : > { %v254_v41 = vpop.xlane.xlu0 %253 }
 0x101   : > { %v258_v40 = vpop.xlane.xlu1 %257 }
 0x102   : > { %v261_v48 = vadd.f32 %v258_v40, %v254_v41 }
 0x104   : > { %v256_v43 = vpop.xlane.xlu0 %255  ;;  %v277_v52 = vmul.f32 0.00390625, %v261_v48 }
 0x105   : > { %v260_v42 = vpop.xlane.xlu1 %259 }
 0x106   : > { %v262_v46 = vadd.f32 %v260_v42, %v256_v43  ;;  %v281_v56 = vmul.f32 %v277_v52, %v277_v52  ;;  %v479_v7 = vmul.f32 %v615_v0, %v277_v52 }
 0x108   : > { %v266_v45 = vpop.xlane.xlu0 %265  ;;  %v278_v50 = vmul.f32 0.00390625, %v262_v46 }
 0x109   : > { %v268_v44 = vpop.xlane.xlu1 %267 }
 0x10a   : > { %v282_v54 = vmul.f32 %v278_v50, %v278_v50  ;;  %v480_v3 = vmul.f32 %v615_v0, %v278_v50 }
 0x10c   : > { %v272_v49 = vpop.xlane.xlu0 %271 }
 0x10d   : > { %v274_v47 = vpop.xlane.xlu1 %273  ;;  %v275_v53 = vadd.f32 %v272_v49, %v266_v45 }
 0x10e   : > { %v276_v51 = vadd.f32 %v274_v47, %v268_v44 }
 0x10f   : > { %v279_v57 = vmul.f32 0.00390625, %v275_v53 }
 0x110   : > { %v280_v55 = vmul.f32 0.00390625, %v276_v51 }
 0x111   : > { %v283_v59 = vsub.f32 %v279_v57, %v281_v56 }
 0x112   : > { %v284_v58 = vsub.f32 %v280_v55, %v282_v54 }
 0x113   : > { %v285_v61 = vmax.f32 %v283_v59, 0.0 }
 0x114   : > { %v286_v60 = vmax.f32 %v284_v58, 0.0 }
 0x115   : > { %v287_v63 = vadd.f32 1e-05, %v285_v61 }
 0x116   : > { %v288_v62 = vadd.f32 1e-05, %v286_v60 }
 0x118   : > { %802 = vrsqrt.f32 %v288_v62 }
 0x119   : > { %804 = vrsqrt.f32 %v287_v63 }
 0x125   : > { %v803_v10 = vpop.eup %802 }
 0x126   : > { %v805_v14 = vpop.eup %804 }
 0x136   : > { %v695_v1 = vpop.f32.mrf.mxu0 }
 0x137   : > { %v730_v2 = vpop.f32.mrf.mxu1 }
 0x138   : > { %v470_v4 = vadd.f32 %v730_v2, %v695_v1  ;;  %v389_v5 = vpop.f32.mrf.mxu0 }
 0x139   : > { %v464_v6 = vpop.f32.mrf.mxu1 }
 0x13a   : > { %v482_v8 = vsub.f32 %v470_v4, %v480_v3  ;;  %v465_v9 = vadd.f32 %v464_v6, %v389_v5 }
 0x13c   : > { %v484_v12 = vmul.f32 %v803_v10, %v482_v8  ;;  %v481_v13 = vsub.f32 %v465_v9, %v479_v7 }
 0x13e   : > { %v490_v15 = vadd.f32 %v616_v11, %v484_v12  ;;  %v483_v16 = vmul.f32 %v805_v14, %v481_v13 }
 0x140   : > { %492 = vst [vmem:[%s245_s7 + $0x8] sm:$0xff] %v490_v15  ;;  %v489_v17 = vadd.f32 %v616_v11, %v483_v16 }
 0x142   : > { %491 = vst [vmem:[%s245_s7] sm:$0xff] %v489_v17 }
 0x143   : > { %899 = shalt.err (!%p896_p5)
}
 0x144   : > { %s900_s26 = scalar_lea.hbm %s1153_s28, 256  ;;  %s904_s30 = scalar_lea.hbm %s1201_s4, 2048 }
 0x145   : > { %p901_p10 = scmp.ne.s32.totalorder %s1153_s28, %s900_s26  ;;  %p905_p4 = scmp.lt.s32.totalorder %s1153_s28, %s1201_s4 }
 0x146   : > { %p906_p6 = scmp.lt.s32.totalorder %s904_s30, %s900_s26 }
 0x147   : > { %p902_p9 = pnand %p901_p10, %p1216_p2 }
 0x148   : > { %p907_p8 = por %p906_p6, %p905_p4 }
 0x149   : > { %p903_p1 = pneg %p902_p9 }
 0x14b   : > { %p908_p3 = pnand %p907_p8, %p903_p1 }
 0x14d   : > { %911 = shalt.err (!%p908_p3)
}
 0x14e   : > { %s962_s7 = smov 128   ;;  %s963_s9 = smov 8  }
 0x14f   : > { %741 = dma.vmem_to_hbm [thread:$0]  (%p1216_p2), %s1155_s8, 256, %s1153_s28, %s494_s6, %s962_s7, %s962_s7, %s963_s9  }
 0x150 PF: > { %p763_p7 = scmp.ge.s32.totalorder %s954_s18, 2  ;;  %s522_s27 = sand.u32 1, %s942_s15  }
 0x151   : > { %p1217_p11 = scmp.ne.s32.totalorder %s1207_s22, 0  ;;  %s523_s24 = scalar_lea.sflag [#allocation4], %s522_s27 }
 0x153   : > { %p755_p12 = pnand %p763_p7, %p1217_p11 }
 0x155   : > { %p756_p13 = pneg %p755_p12 }
 0x157   : > { %937 = dma.done.wait (%p756_p13), %s523_s24, 256  }
 0x158   : > { %939 = vsyncadd (%p756_p13), %s523_s24, 4294967040  ;;  %p18_p0 = scmp.ge.s32.totalorder %s1066_s11, 10   ;;  %s1218_s15 = smov %s946_s16 }
 0x159   : > { %s1219_s16 = smov %s950_s17  ;;  %s1220_s17 = smov %s1082_s20 }
 0x15a   : > { %s1221_s18 = smov %s1066_s11  ;;  %20 = sbr.rel (!%p18_p0) target bundleno = 6 (0x6), region = 90 }
 0x15f   :  { %528 = vsyncpa [#allocation3], 1 }
 0x160   :  { %530 = vsyncpa [#allocation3 + $0x1], 1 }
 0x161   :  { %531 = vsyncpa [#allocation6], 1 }
 0x162   :  { %532 = vsyncpa [#allocation4], 1 }
 0x163   :  { %534 = vsyncpa [#allocation4 + $0x1], 1 }

</bundles_post_ra>
